<compile_context>
chip_gen: v7x
topology: tpu7x:2x2x1
jax: 0.10.0
libtpu: 0.0.40
codegen_flags: <defaults>
</compile_context>

<pallas_src>
import jax
import jax.numpy as jnp
from jax.experimental import pallas as pl
from jax.experimental.pallas import tpu as pltpu

HIDDEN = 120   # nn.Linear(n_states, 120)
H_PAD = 128    # hidden dim padded to lane multiple (intermediate stays lane-dense)


def _dqn_kernel(x_ref, w1_ref, b1_ref, w2_ref, b2_ref, out_ref):
    # fc1: (tb, n_states) @ (n_states, 128) + (1, 128)
    h = jnp.dot(x_ref[...], w1_ref[...], preferred_element_type=jnp.float32)
    # fc2: ReLU
    h = jnp.maximum(h + b1_ref[...], 0.0)
    # fc3: (tb, 128) @ (128, n_actions) + (1, n_actions)
    o = jnp.dot(h, w2_ref[...], preferred_element_type=jnp.float32) + b2_ref[...]
    out_ref[...] = o.astype(out_ref.dtype)


def prepare_params(w1_t, b1, w2_t, b2):
    """One-time padding of parameters to the kernel's layout.

    w1_t: (n_states, 120), b1: (120,), w2_t: (120, n_actions), b2: (n_actions,).
    Hidden dim is zero-padded to 128 (exact: ReLU(0)=0 and zero w2 rows add 0).
    The action dim is NOT padded so the kernel writes only true output bytes.
    """
    n_states = w1_t.shape[0]
    n_actions = w2_t.shape[1]
    w1_p = jnp.zeros((n_states, H_PAD), jnp.float32).at[:, :HIDDEN].set(w1_t)
    b1_p = jnp.zeros((1, H_PAD), jnp.float32).at[0, :HIDDEN].set(b1)
    w2_p = jnp.zeros((H_PAD, n_actions), jnp.float32).at[:HIDDEN, :].set(w2_t)
    b2_p = b2.reshape(1, n_actions).astype(jnp.float32)
    return w1_p, b1_p, w2_p, b2_p


def _pick_tb(B):
    """Batch tile: multiple of 8; >=2 grid steps when B >= 16 (v7x megacore);
    capped at 1024 rows for large batches to amortize per-step overhead."""
    if B >= 16:
        return min(1024, 8 * pl.cdiv(B, 16))
    return 8 * pl.cdiv(max(B, 1), 8)


def dqn_forward(x, w1_p, b1_p, w2_p, b2_p, *, tb=None):
    """x: (B, n_states) f32; params pre-padded via prepare_params().
    Returns (B, n_actions) f32."""
    B, n_states = x.shape
    n_actions = w2_p.shape[1]

    if tb is None:
        tb = _pick_tb(B)
    n_tiles = pl.cdiv(B, tb)

    out = pl.pallas_call(
        _dqn_kernel,
        out_shape=jax.ShapeDtypeStruct((B, n_actions), jnp.float32),
        grid=(n_tiles,),
        in_specs=[
            pl.BlockSpec((tb, n_states), lambda i: (i, 0)),      # x tile (pipelined)
            pl.BlockSpec((n_states, H_PAD), lambda i: (0, 0)),   # w1 resident
            pl.BlockSpec((1, H_PAD), lambda i: (0, 0)),          # b1 resident
            pl.BlockSpec((H_PAD, n_actions), lambda i: (0, 0)),  # w2 resident
            pl.BlockSpec((1, n_actions), lambda i: (0, 0)),      # b2 resident
        ],
        out_specs=pl.BlockSpec((tb, n_actions), lambda i: (i, 0)),
        compiler_params=pltpu.CompilerParams(
            dimension_semantics=("parallel",)),  # shard batch across TCs (v7x)
    )(x, w1_p, b1_p, w2_p, b2_p)
    return out


def init_params(key, n_states, n_actions):
    """Deterministic init mimicking nn.Linear's uniform(-1/sqrt(in), 1/sqrt(in))."""
    k1, k2, k3, k4 = jax.random.split(key, 4)
    lim1 = 1.0 / jnp.sqrt(jnp.float32(n_states))
    lim2 = 1.0 / jnp.sqrt(jnp.float32(HIDDEN))
    # Stored already transposed: (in, out)
    w1_t = jax.random.uniform(k1, (n_states, HIDDEN), jnp.float32, -lim1, lim1)
    b1 = jax.random.uniform(k2, (HIDDEN,), jnp.float32, -lim1, lim1)
    w2_t = jax.random.uniform(k3, (HIDDEN, n_actions), jnp.float32, -lim2, lim2)
    b2 = jax.random.uniform(k4, (n_actions,), jnp.float32, -lim2, lim2)
    return w1_t, b1, w2_t, b2


# TODO(synk): the Adam optimizer / training step in the PyTorch module is out of
# scope for a forward-pass kernel and is not implemented here.

if __name__ == "__main__":
    key = jax.random.PRNGKey(0)
    kx, kx2, kp = jax.random.split(key, 3)

    n_states, n_actions = 16, 4
    w1_t, b1, w2_t, b2 = init_params(kp, n_states, n_actions)
    params = prepare_params(w1_t, b1, w2_t, b2)   # padded once, outside forward

    def ref_fwd(x):
        return jnp.maximum(x @ w1_t + b1, 0.0) @ w2_t + b2

    # Small batch (single tile, grid=(1,)).
    B = 8
    x = jax.random.normal(kx, (B, n_states), jnp.float32)
    out = jax.block_until_ready(dqn_forward(x, *params))
    assert out.shape == (B, n_actions)
    assert jnp.allclose(out, ref_fwd(x), atol=1e-5, rtol=1e-5)

    # Ragged batch (2 tiles, exercises the boundary block without padding x).
    B2 = 20
    x2 = jax.random.normal(kx2, (B2, n_states), jnp.float32)
    out2 = jax.block_until_ready(dqn_forward(x2, *params))
    assert out2.shape == (B2, n_actions)
    assert jnp.allclose(out2, ref_fwd(x2), atol=1e-5, rtol=1e-5)

    print("KERNEL_OK")
</pallas_src>

<mosaic_0001>
module attributes {stable_mosaic.version = 11 : i64} {
  func.func @_dqn_kernel(%arg0: i32, %arg1: memref<8x16xf32, #tpu.memory_space<vmem>>, %arg2: memref<16x128xf32, #tpu.memory_space<vmem>>, %arg3: memref<1x128xf32, #tpu.memory_space<vmem>>, %arg4: memref<128x4xf32, #tpu.memory_space<vmem>>, %arg5: memref<1x4xf32, #tpu.memory_space<vmem>>, %arg6: memref<8x4xf32, #tpu.memory_space<vmem>>) attributes {dimension_semantics = [#tpu.dimension_semantics<parallel>], iteration_bounds = array<i64: 1>, scalar_prefetch = 0 : i64, scratch_operands = 0 : i64, tpu.core_type = #tpu.core_type<tc>, window_params = [{transform_indices = @transform_0, window_bounds = array<i64: 8, 16>}, {pipeline_mode = #tpu.pipeline_mode<synchronous>, transform_indices = @transform_1, window_bounds = array<i64: 16, 128>}, {pipeline_mode = #tpu.pipeline_mode<synchronous>, transform_indices = @transform_2, window_bounds = array<i64: 1, 128>}, {pipeline_mode = #tpu.pipeline_mode<synchronous>, transform_indices = @transform_3, window_bounds = array<i64: 128, 4>}, {pipeline_mode = #tpu.pipeline_mode<synchronous>, transform_indices = @transform_4, window_bounds = array<i64: 1, 4>}, {transform_indices = @transform_5, window_bounds = array<i64: 8, 4>}]} {
    %c0 = arith.constant 0 : index
    %c0_0 = arith.constant 0 : index
    %0 = vector.load %arg1[%c0, %c0_0] : memref<8x16xf32, #tpu.memory_space<vmem>>, vector<8x16xf32>
    %c0_1 = arith.constant 0 : index
    %c0_2 = arith.constant 0 : index
    %1 = vector.load %arg2[%c0_1, %c0_2] : memref<16x128xf32, #tpu.memory_space<vmem>>, vector<16x128xf32>
    %cst = arith.constant dense<0.000000e+00> : vector<8x128xf32>
    %2 = tpu.matmul %0, %1, %cst {dimension_numbers = #tpu.dot_dimension_numbers<[1], [0], [0], [1], [0, 0, 1, 1], [], []>} : vector<8x16xf32>, vector<16x128xf32>, vector<8x128xf32> -> vector<8x128xf32>
    %c0_3 = arith.constant 0 : index
    %c0_4 = arith.constant 0 : index
    %3 = vector.load %arg3[%c0_3, %c0_4] : memref<1x128xf32, #tpu.memory_space<vmem>>, vector<1x128xf32>
    %4 = vector.broadcast %3 : vector<1x128xf32> to vector<8x128xf32>
    %5 = arith.addf %2, %4 : vector<8x128xf32>
    %cst_5 = arith.constant 0.000000e+00 : f32
    %6 = vector.broadcast %cst_5 : f32 to vector<8x128xf32>
    %7 = arith.maximumf %5, %6 : vector<8x128xf32>
    %c0_6 = arith.constant 0 : index
    %c0_7 = arith.constant 0 : index
    %8 = vector.load %arg4[%c0_6, %c0_7] : memref<128x4xf32, #tpu.memory_space<vmem>>, vector<128x4xf32>
    %cst_8 = arith.constant dense<0.000000e+00> : vector<8x4xf32>
    %9 = tpu.matmul %7, %8, %cst_8 {dimension_numbers = #tpu.dot_dimension_numbers<[1], [0], [0], [1], [0, 0, 1, 1], [], []>} : vector<8x128xf32>, vector<128x4xf32>, vector<8x4xf32> -> vector<8x4xf32>
    %c0_9 = arith.constant 0 : index
    %c0_10 = arith.constant 0 : index
    %10 = vector.load %arg5[%c0_9, %c0_10] : memref<1x4xf32, #tpu.memory_space<vmem>>, vector<1x4xf32>
    %11 = vector.broadcast %10 : vector<1x4xf32> to vector<8x4xf32>
    %12 = arith.addf %9, %11 : vector<8x4xf32>
    %c0_11 = arith.constant 0 : index
    %c0_12 = arith.constant 0 : index
    %13 = vector.load %arg6[%c0_11, %c0_12] : memref<8x4xf32, #tpu.memory_space<vmem>>, vector<8x4xf32>
    tpu.vector_store %arg6[%c0_11, %c0_12], %12 {strides = array<i32>} : memref<8x4xf32, #tpu.memory_space<vmem>>, vector<8x4xf32>,
    return
  }
  func.func @transform_0(%arg0: i32) -> (i32, i32) {
    %c0_i32 = arith.constant 0 : i32
    %c0_i32_0 = arith.constant 0 : i32
    return %arg0, %c0_i32 : i32, i32
  }
  func.func @transform_1(%arg0: i32) -> (i32, i32) {
    %c0_i32 = arith.constant 0 : i32
    %c0_i32_0 = arith.constant 0 : i32
    %c0_i32_1 = arith.constant 0 : i32
    return %c0_i32, %c0_i32_0 : i32, i32
  }
  func.func @transform_2(%arg0: i32) -> (i32, i32) {
    %c0_i32 = arith.constant 0 : i32
    %c0_i32_0 = arith.constant 0 : i32
    %c0_i32_1 = arith.constant 0 : i32
    return %c0_i32, %c0_i32_0 : i32, i32
  }
  func.func @transform_3(%arg0: i32) -> (i32, i32) {
    %c0_i32 = arith.constant 0 : i32
    %c0_i32_0 = arith.constant 0 : i32
    %c0_i32_1 = arith.constant 0 : i32
    return %c0_i32, %c0_i32_0 : i32, i32
  }
  func.func @transform_4(%arg0: i32) -> (i32, i32) {
    %c0_i32 = arith.constant 0 : i32
    %c0_i32_0 = arith.constant 0 : i32
    %c0_i32_1 = arith.constant 0 : i32
    return %c0_i32, %c0_i32_0 : i32, i32
  }
  func.func @transform_5(%arg0: i32) -> (i32, i32) {
    %c0_i32 = arith.constant 0 : i32
    %c0_i32_0 = arith.constant 0 : i32
    return %arg0, %c0_i32 : i32, i32
  }
}

</mosaic_0001>

<bundles_post_ra>
// kernel: tpu_custom_call.1
= control target key start
LH: loop header
LB: loop body
LE: loop exit
PB: predicated region body
PF: predicated region fallthrough
CT: control target
= control target key end

     0   :  { %v299_v0 = vmov 0.0|0.0   ;;  %vm300_vm0 = vmmov 0   ;;  %v301_v3 = vmov 0.0   ;;  %vm30_vm1 = vcmask 130048   ;;  %s398_s1 = inlined_call_operand.vmem [shape: f32[16,128], index: 1, kind: input, shape index: {}]   ;;  %s399_s3 = inlined_call_operand.vmem [shape: f32[128,4], index: 3, kind: input, shape index: {}]   ;;  %s400_s0 = inlined_call_operand.vmem [shape: f32[8,16], index: 0, kind: input, shape index: {}]   ;;  %s401_s2 = inlined_call_operand.vmem [shape: f32[1,128], index: 2, kind: input, shape index: {}]   ;;  %s402_s4 = inlined_call_operand.vmem [shape: f32[1,4], index: 4, kind: input, shape index: {}]   ;;  %s403_s5 = inlined_call_operand.vmem [shape: f32[8,4], index: 5, kind: output, shape index: {}]  }
   0x1   :  { %269 = vmatprep.subr.bf16.mxu0 %v299_v0  ;;  %v21_v1 = vld [vmem:[%s398_s1] sm:$0xff]  ;;  %v22_v2 = vld [vmem:[%s398_s1 + $0x8] sm:$0xff]  ;;  %231 = vmatprep.mubr.msk.f32.mxu0 %vm300_vm0, %v301_v3  ;;  %v107_v7 = vld [vmem:[%s399_s3 + $0x10] sm:$0xff]  ;;  %vm198_vm2 = vcmask 31744  }
   0x2   :  { %v270_v4 = vpack.c.bf16 %v22_v2, %v21_v1  ;;  %272 = vmatprep.subr.bf16.mxu1 %v299_v0  ;;  %v105_v5 = vld [vmem:[%s399_s3] sm:$0xff]  ;;  %v106_v6 = vld [vmem:[%s399_s3 + $0x8] sm:$0xff]  ;;  %266 = vmatprep.mubr.msk.f32.mxu1 %vm300_vm0, %v301_v3  ;;  %v108_v9 = vld [vmem:[%s399_s3 + $0x18] sm:$0xff] }
   0x3   :  { %v273_v8 = vpack.c.bf16 %v106_v6, %v105_v5  ;;  %v20_v10 = vld [vmem:[%s400_s0] sm:$0xff]  ;;  %v276_v11 = vpack.c.bf16 %v108_v9, %v107_v7  ;;  %v110_v13 = vld [vmem:[%s399_s3 + $0x28] sm:$0xff]  ;;  %v111_v15 = vld [vmem:[%s399_s3 + $0x30] sm:$0xff] }
   0x4   :  { %271 = vmatpush3.bf16.msra.mxu0 %v270_v4  ;;  %v109_v12 = vld [vmem:[%s399_s3 + $0x20] sm:$0xff]  ;;  %v112_v16 = vld [vmem:[%s399_s3 + $0x38] sm:$0xff]  ;;  %v114_v19 = vld [vmem:[%s399_s3 + $0x48] sm:$0xff] }
   0x5   :  { %274 = vmatpush3.bf16.msra.mxu1 %v273_v8  ;;  %v279_v14 = vpack.c.bf16 %v110_v13, %v109_v12  ;;  %v282_v17 = vpack.c.bf16 %v112_v16, %v111_v15  ;;  %v113_v18 = vld [vmem:[%s399_s3 + $0x40] sm:$0xff]  ;;  %v115_v21 = vld [vmem:[%s399_s3 + $0x50] sm:$0xff]  ;;  %v116_v22 = vld [vmem:[%s399_s3 + $0x58] sm:$0xff] }
   0x6   :  { %275 = vmatprep.subr.bf16.mxu1 %v299_v0  ;;  %v285_v20 = vpack.c.bf16 %v114_v19, %v113_v18  ;;  %v288_v23 = vpack.c.bf16 %v116_v22, %v115_v21  ;;  %v117_v24 = vld [vmem:[%s399_s3 + $0x60] sm:$0xff]  ;;  %v118_v25 = vld [vmem:[%s399_s3 + $0x68] sm:$0xff]  ;;  %v119_v27 = vld [vmem:[%s399_s3 + $0x70] sm:$0xff] }
   0x7   :  { %232 = vmatmul.mubr.msk.f32.vlgmr.msra.gmra.mrb[0].mxu0 %vm30_vm1, %v20_v10  ;;  %v291_v26 = vpack.c.bf16 %v118_v25, %v117_v24  ;;  %v120_v28 = vld [vmem:[%s399_s3 + $0x78] sm:$0xff]  ;;  %v204_v30 = vld [vmem:[%s401_s2] ss:$0 sm:$0xff] }
   0x8   :  { %v294_v29 = vpack.c.bf16 %v120_v28, %v119_v27  ;;  %v206_v35 = vld [vmem:[%s402_s4] ss:$0 sm:$0xff] }
   0x9   :  { %277 = vmatpush3.bf16.msra.mxu1 %v276_v11 }
   0xa   :  { %278 = vmatprep.subr.bf16.mxu1 %v299_v0 }
   0xd   :  { %280 = vmatpush3.bf16.msra.mxu1 %v279_v14 }
   0xe   :  { %281 = vmatprep.subr.bf16.mxu1 %v299_v0 }
  0x11   :  { %283 = vmatpush3.bf16.msra.mxu1 %v282_v17 }
  0x12   :  { %284 = vmatprep.subr.bf16.mxu1 %v299_v0 }
  0x15   :  { %286 = vmatpush3.bf16.msra.mxu1 %v285_v20 }
  0x16   :  { %287 = vmatprep.subr.bf16.mxu1 %v299_v0 }
  0x19   :  { %289 = vmatpush3.bf16.msra.mxu1 %v288_v23 }
  0x1a   :  { %290 = vmatprep.subr.bf16.mxu1 %v299_v0 }
  0x1d   :  { %292 = vmatpush3.bf16.msra.mxu1 %v291_v26 }
  0x1e   :  { %293 = vmatprep.subr.bf16.mxu1 %v299_v0 }
  0x21   :  { %295 = vmatpush3.bf16.msra.mxu1 %v294_v29 }
  0xda   :  { %v100_v31 = vpop.f32.mrb[0].mxu0 }
  0xdb   :  { %v101_v32 = vadd.f32 %v204_v30, %v100_v31  ;;  %v233_v33 = vpop.f32.mrb[1].mxu0 }
  0xdd   :  { %v104_v34 = vmax.f32 %v101_v32, 0.0 }
  0xdf   :  { %267 = vmatmul.mubr.f32.vlgmr.msra.gmra.mrb[0].mxu1 %v104_v34 }
 0x1b2   :  { %v194_v36 = vpop.f32.mrb[0].mxu1 }
 0x1b3   :  { %v195_v37 = vadd.f32 %v206_v35, %v194_v36  ;;  %v268_v38 = vpop.f32.mrb[1].mxu1 }
 0x1b5   :  { %199 = vst.msk [vmem:[%s403_s5] sm:$0xff] %vm198_vm2, %v195_v37 }

</bundles_post_ra>
